<compile_context>
chip_gen: v6e
topology: v6e:2x2x1
jax: 0.10.0
libtpu: 0.0.40
codegen_flags: <defaults>
</compile_context>

<pallas_src>
import functools

import jax
import jax.numpy as jnp
from jax.experimental import pallas as pl
from jax.experimental.pallas import tpu as pltpu


_SUM_CHUNK = 256           # spatial rows accumulated per f32-reduce step
_SLACK_BYTES = 256 * 1024  # per-call scheduling/alignment slack in the budget


# ----------------------------------------------------------------------------
# In-kernel helpers
# ----------------------------------------------------------------------------
def _spatial_sum_f32(x_ref):
    """f32 sum over the spatial (sublane) axis of a (Bt, S, C) block without
    materializing a full f32 copy of the block: accumulate chunk by chunk."""
    bt, s, c = x_ref.shape
    if s <= _SUM_CHUNK:
        return jnp.sum(x_ref[...], axis=1, dtype=jnp.float32)

    chunk = _SUM_CHUNK          # multiple of 8 -> aligned sublane slices
    n_full = s // chunk

    def body(i, acc):
        start = pl.multiple_of(i * chunk, chunk)
        return acc + jnp.sum(x_ref[:, pl.ds(start, chunk), :], axis=1,
                             dtype=jnp.float32)

    acc = jax.lax.fori_loop(0, n_full, body, jnp.zeros((bt, c), jnp.float32))
    rem = s - n_full * chunk
    if rem:  # static remainder chunk
        acc = acc + jnp.sum(x_ref[:, pl.ds(n_full * chunk, rem), :], axis=1,
                            dtype=jnp.float32)
    return acc


def _excitation(y_f32, w1_ref, w2_ref):
    """relu(y @ W1) @ W2 -> sigmoid, all in f32 (tiny vs. the HBM traffic)."""
    h = jnp.maximum(
        jnp.dot(y_f32, w1_ref[...].astype(jnp.float32),
                preferred_element_type=jnp.float32), 0.0)
    return jax.nn.sigmoid(
        jnp.dot(h, w2_ref[...].astype(jnp.float32),
                preferred_element_type=jnp.float32))


# ----------------------------------------------------------------------------
# Kernels
# ----------------------------------------------------------------------------
def _se_fused_kernel(x_ref, w1_ref, w2_ref, o_ref):
    """Single-pass SE: x_ref/o_ref are (Bt, HW, C) channels-last blocks."""
    hw = x_ref.shape[1]
    y = _spatial_sum_f32(x_ref) * (1.0 / float(hw))          # (Bt, C) f32
    g = _excitation(y, w1_ref, w2_ref)                        # (Bt, C) f32
    # Per-channel rescale in the native dtype.  Divergence (documented): the
    # scale is rounded to the input dtype before the multiply, avoiding a full
    # f32 copy of the block; the reference multiplies in f32.
    o_ref[...] = x_ref[...] * g.astype(o_ref.dtype)[:, None, :]


def _se_squeeze_kernel(x_ref, w1_ref, w2_ref, s_ref, acc_ref, *, inv_hw):
    """Pass 1 of the split path: chunked spatial reduce + MLP -> s (Bt,1,C)."""
    hh = pl.program_id(1)

    @pl.when(hh == 0)
    def _():
        acc_ref[...] = jnp.zeros_like(acc_ref)

    acc_ref[...] += _spatial_sum_f32(x_ref)

    @pl.when(hh == pl.num_programs(1) - 1)
    def _():
        g = _excitation(acc_ref[...] * inv_hw, w1_ref, w2_ref)  # (Bt, C) f32
        s_ref[...] = g[:, None, :]


def _se_excite_kernel(x_ref, s_ref, o_ref):
    """Pass 2 of the split path: stream x and rescale by s (broadcast over HW)."""
    o_ref[...] = x_ref[...] * s_ref[...].astype(o_ref.dtype)


# ----------------------------------------------------------------------------
# Wrapper / tiling policy
# ----------------------------------------------------------------------------
def _tpu_vmem_policy():
    """Returns (usable_vmem_ceiling_bytes, multi_tensorcore) for the local chip."""
    try:
        cap = int(pltpu.get_tpu_info().vmem_capacity_bytes)
    except Exception:
        cap = 64 * 1024 * 1024          # unknown -> assume the tightest (v7x)
    multi_tc = cap <= 64 * 1024 * 1024  # v7x: 64 MiB per TC, 2 TCs per chip
    headroom = (8 if multi_tc else 16) * 1024 * 1024
    ceiling = max(cap - headroom, 8 * 1024 * 1024)
    return ceiling, multi_tc


def _weight_bytes(w1, w2):
    return (w1.size * jnp.dtype(w1.dtype).itemsize
            + w2.size * jnp.dtype(w2.dtype).itemsize)


def _split_vmem_need(bt, st, c, itemsize, w_bytes):
    block = bt * st * c * itemsize
    sum_tmp = bt * min(_SUM_CHUNK, st) * c * 4
    # 2x double-buffered in + 2x double-buffered out + ~2 blocks of elementwise
    # temporaries (broadcast + product), plus the tiny f32 accumulator/scale.
    return 6 * block + sum_tmp + 8 * bt * c * 4 + 2 * w_bytes + _SLACK_BYTES


def _se_split(x, w1, w2, *, budget, ceiling, spatial_tile):
    """Two-pass fallback: squeeze+MLP over HW chunks, then a parallel excite."""
    B, HW, C = x.shape
    Cr = w1.shape[1]
    itemsize = jnp.dtype(x.dtype).itemsize
    w_bytes = _weight_bytes(w1, w2)

    if spatial_tile is not None:
        st = int(spatial_tile)
        if HW % st != 0 or (st % 8 != 0 and st != HW):
            raise ValueError("spatial_tile must divide H*W and be a multiple of 8")
    else:
        st = 0
        for cand in range(8, HW + 1, 8):      # multiple-of-8 divisors of HW
            if HW % cand == 0 and _split_vmem_need(1, cand, C, itemsize, w_bytes) <= budget:
                st = cand
        if st == 0:
            if HW % 8 == 0:
                st = 8                        # smallest aligned tile
            else:
                # TODO(synk): pad HW to a multiple of 8 in the wrapper instead.
                raise ValueError(
                    "SE feature map too large for VMEM and H*W is not a "
                    "multiple of 8; cannot tile the spatial axis.")

    nh = HW // st
    bt = 1                                    # fallback path -> one image/tile
    nb = B

    vmem_limit = int(min(ceiling,
                         max(_split_vmem_need(bt, st, C, itemsize, w_bytes)
                             + 2 * 1024 * 1024, 32 * 1024 * 1024)))

    s = pl.pallas_call(
        functools.partial(_se_squeeze_kernel, inv_hw=1.0 / float(HW)),
        out_shape=jax.ShapeDtypeStruct((B, 1, C), jnp.float32),
        grid=(nb, nh),
        in_specs=[
            pl.BlockSpec((bt, st, C), lambda b, h: (b, h, 0)),
            pl.BlockSpec((C, Cr), lambda b, h: (0, 0)),
            pl.BlockSpec((Cr, C), lambda b, h: (0, 0)),
        ],
        out_specs=pl.BlockSpec((bt, 1, C), lambda b, h: (b, 0, 0)),
        scratch_shapes=[pltpu.VMEM((bt, C), jnp.float32)],
        compiler_params=pltpu.CompilerParams(
            dimension_semantics=("parallel", "arbitrary"),
            vmem_limit_bytes=vmem_limit),
    )(x, w1, w2)

    out = pl.pallas_call(
        _se_excite_kernel,
        out_shape=jax.ShapeDtypeStruct((B, HW, C), x.dtype),
        grid=(nb, nh),
        in_specs=[
            pl.BlockSpec((bt, st, C), lambda b, h: (b, h, 0)),
            pl.BlockSpec((bt, 1, C), lambda b, h: (b, 0, 0)),
        ],
        out_specs=pl.BlockSpec((bt, st, C), lambda b, h: (b, h, 0)),
        compiler_params=pltpu.CompilerParams(
            dimension_semantics=("parallel", "parallel"),
            vmem_limit_bytes=vmem_limit),
    )(x, s)
    return out


def se_layer(x_nchw, w1, w2, *, block_budget_bytes=None, force_split=False,
             spatial_tile=None):
    """SELayer forward.  x_nchw: (B, C, H, W); w1: (C, C//r); w2: (C//r, C)."""
    B, C, H, W = x_nchw.shape
    HW = H * W
    Cr = w1.shape[1]
    assert w1.shape == (C, Cr) and w2.shape == (Cr, C)

    # Channels-last relayout: C on the lane axis -> lane-dense stores for real
    # SE spatial sizes (HW = 49/196/... never divides 128; C usually does).
    x = jnp.transpose(x_nchw, (0, 2, 3, 1)).reshape(B, HW, C)
    itemsize = jnp.dtype(x.dtype).itemsize
    w_bytes = _weight_bytes(w1, w2)

    ceiling, multi_tc = _tpu_vmem_policy()
    budget = ceiling if block_budget_bytes is None else min(int(block_budget_bytes), ceiling)

    # Largest batch tile whose footprint (2x double-buffered in + out, ~2 blocks
    # of elementwise temporaries, bounded f32 reduce chunk) fits the budget.
    # Only multi-TC chips (v7x) keep >= 2 grid steps; v5e/v6e take the full batch.
    per_bt = 6 * HW * C * itemsize + min(_SUM_CHUNK, HW) * C * 4
    avail = budget - 2 * w_bytes - _SLACK_BYTES
    max_bt = B if (not multi_tc or B < 2) else max(1, B // 2)
    bt = min(max_bt, avail // per_bt) if avail >= per_bt else 0

    if force_split or bt < 1:
        out = _se_split(x, w1, w2, budget=budget, ceiling=ceiling,
                        spatial_tile=spatial_tile)
    else:
        nb = pl.cdiv(B, bt)   # ragged last tile: OOB rows are dropped on write
        vmem_limit = int(min(ceiling,
                             max(bt * per_bt + 2 * w_bytes + _SLACK_BYTES
                                 + 2 * 1024 * 1024, 32 * 1024 * 1024)))
        cost = pl.CostEstimate(
            flops=2 * B * HW * C + 4 * B * C * Cr,
            transcendentals=B * C,
            bytes_accessed=2 * B * HW * C * itemsize + w_bytes,
        )
        out = pl.pallas_call(
            _se_fused_kernel,
            out_shape=jax.ShapeDtypeStruct((B, HW, C), x.dtype),
            grid=(nb,),
            in_specs=[
                pl.BlockSpec((bt, HW, C), lambda b: (b, 0, 0)),
                pl.BlockSpec((C, Cr), lambda b: (0, 0)),
                pl.BlockSpec((Cr, C), lambda b: (0, 0)),
            ],
            out_specs=pl.BlockSpec((bt, HW, C), lambda b: (b, 0, 0)),
            compiler_params=pltpu.CompilerParams(
                dimension_semantics=("parallel",),
                vmem_limit_bytes=vmem_limit),
            cost_estimate=cost,
        )(x, w1, w2)

    return out.reshape(B, H, W, C).transpose(0, 3, 1, 2)


# ----------------------------------------------------------------------------
# Reference + self-test
# ----------------------------------------------------------------------------
def se_reference(x_nchw, w1, w2):
    """Pure-JAX reference of the PyTorch forward."""
    xf = x_nchw.astype(jnp.float32)
    y = jnp.mean(xf, axis=(2, 3))                              # (B, C)
    h = jnp.maximum(y @ w1.astype(jnp.float32), 0.0)           # (B, Cr)
    g = jax.nn.sigmoid(h @ w2.astype(jnp.float32))             # (B, C)
    return (xf * g[:, :, None, None]).astype(x_nchw.dtype)


if __name__ == "__main__":
    B, C, H, W = 2, 32, 16, 16
    reduction = 16
    Cr = C // reduction  # = 2

    key = jax.random.PRNGKey(0)
    kx, k1, k2 = jax.random.split(key, 3)

    x = jax.random.normal(kx, (B, C, H, W), dtype=jnp.float32)
    # nn.Linear(channel, channel//r, bias=False).weight is (Cr, C); we store the
    # transposed (C, Cr) so the kernel computes y @ W1 directly (same math).
    w1 = jax.random.normal(k1, (C, Cr), dtype=jnp.float32) * 0.1
    w2 = jax.random.normal(k2, (Cr, C), dtype=jnp.float32) * 0.1

    ref = se_reference(x, w1, w2)

    # Fused single-pass path (f32).  1e-4 tolerance covers default-precision
    # MXU rounding of the tiny excitation matmuls.
    out = se_layer(x, w1, w2)
    jax.block_until_ready(out)
    assert out.shape == x.shape
    assert jnp.allclose(out, ref, atol=1e-4, rtol=1e-4), "f32 fused mismatch"

    # bf16 path (native-dtype excite multiply & writeback).
    xb = x.astype(jnp.bfloat16)
    outb = se_layer(xb, w1, w2)
    jax.block_until_ready(outb)
    refb = se_reference(xb, w1, w2)
    assert jnp.allclose(outb.astype(jnp.float32), refb.astype(jnp.float32),
                        atol=2e-2, rtol=2e-2), "bf16 fused mismatch"

    # Exercise the two-pass fallback (used when one image's block exceeds the
    # VMEM budget) with multiple spatial chunks.
    outs = se_layer(x, w1, w2, force_split=True, spatial_tile=64)
    jax.block_until_ready(outs)
    assert jnp.allclose(outs, ref, atol=1e-4, rtol=1e-4), "split-path mismatch"

    print("KERNEL_OK")
</pallas_src>

<mosaic_0001>
module attributes {stable_mosaic.version = 11 : i64} {
  func.func @_se_fused_kernel(%arg0: i32, %arg1: memref<1x256x32xf32, #tpu.memory_space<vmem>>, %arg2: memref<32x2xf32, #tpu.memory_space<vmem>>, %arg3: memref<2x32xf32, #tpu.memory_space<vmem>>, %arg4: memref<1x256x32xf32, #tpu.memory_space<vmem>>) attributes {dimension_semantics = [#tpu.dimension_semantics<parallel>], iteration_bounds = array<i64: 2>, scalar_prefetch = 0 : i64, scratch_operands = 0 : i64, tpu.core_type = #tpu.core_type<tc>, window_params = [{transform_indices = @transform_0, window_bounds = array<i64: 1, 256, 32>}, {pipeline_mode = #tpu.pipeline_mode<synchronous>, transform_indices = @transform_1, window_bounds = array<i64: 32, 2>}, {pipeline_mode = #tpu.pipeline_mode<synchronous>, transform_indices = @transform_2, window_bounds = array<i64: 2, 32>}, {transform_indices = @transform_3, window_bounds = array<i64: 1, 256, 32>}]} {
    %c0 = arith.constant 0 : index
    %c0_0 = arith.constant 0 : index
    %c0_1 = arith.constant 0 : index
    %0 = vector.load %arg1[%c0, %c0_0, %c0_1] : memref<1x256x32xf32, #tpu.memory_space<vmem>>, vector<1x256x32xf32>
    %cst = arith.constant dense<0.000000e+00> : vector<1x32xf32>
    %1 = vector.multi_reduction <add>, %0, %cst [1] : vector<1x256x32xf32> to vector<1x32xf32>
    %cst_2 = arith.constant 3.906250e-03 : f32
    %2 = vector.broadcast %cst_2 : f32 to vector<1x32xf32>
    %3 = arith.mulf %1, %2 : vector<1x32xf32>
    %c0_3 = arith.constant 0 : index
    %c0_4 = arith.constant 0 : index
    %4 = vector.load %arg2[%c0_3, %c0_4] : memref<32x2xf32, #tpu.memory_space<vmem>>, vector<32x2xf32>
    %cst_5 = arith.constant dense<0.000000e+00> : vector<1x2xf32>
    %5 = tpu.matmul %3, %4, %cst_5 {dimension_numbers = #tpu.dot_dimension_numbers<[1], [0], [0], [1], [0, 0, 1, 1], [], []>} : vector<1x32xf32>, vector<32x2xf32>, vector<1x2xf32> -> vector<1x2xf32>
    %cst_6 = arith.constant 0.000000e+00 : f32
    %6 = vector.broadcast %cst_6 : f32 to vector<1x2xf32>
    %7 = arith.maximumf %5, %6 : vector<1x2xf32>
    %c0_7 = arith.constant 0 : index
    %c0_8 = arith.constant 0 : index
    %8 = vector.load %arg3[%c0_7, %c0_8] : memref<2x32xf32, #tpu.memory_space<vmem>>, vector<2x32xf32>
    %cst_9 = arith.constant dense<0.000000e+00> : vector<1x32xf32>
    %9 = tpu.matmul %7, %8, %cst_9 {dimension_numbers = #tpu.dot_dimension_numbers<[1], [0], [0], [1], [0, 0, 1, 1], [], []>} : vector<1x2xf32>, vector<2x32xf32>, vector<1x32xf32> -> vector<1x32xf32>
    %10 = arith.negf %9 : vector<1x32xf32>
    %11 = math.exp %10 : vector<1x32xf32>
    %cst_10 = arith.constant 1.000000e+00 : f32
    %12 = vector.broadcast %cst_10 : f32 to vector<1x32xf32>
    %13 = arith.addf %12, %11 : vector<1x32xf32>
    %14 = arith.divf %12, %13 : vector<1x32xf32>
    %c0_11 = arith.constant 0 : index
    %c0_12 = arith.constant 0 : index
    %c0_13 = arith.constant 0 : index
    %15 = vector.load %arg1[%c0_11, %c0_12, %c0_13] : memref<1x256x32xf32, #tpu.memory_space<vmem>>, vector<1x256x32xf32>
    %16 = vector.shape_cast %14 : vector<1x32xf32> to vector<1x1x32xf32>
    %17 = vector.broadcast %16 : vector<1x1x32xf32> to vector<1x256x32xf32>
    %18 = arith.mulf %15, %17 : vector<1x256x32xf32>
    %c0_14 = arith.constant 0 : index
    %c0_15 = arith.constant 0 : index
    %c0_16 = arith.constant 0 : index
    %19 = vector.load %arg4[%c0_14, %c0_15, %c0_16] : memref<1x256x32xf32, #tpu.memory_space<vmem>>, vector<1x256x32xf32>
    tpu.vector_store %arg4[%c0_14, %c0_15, %c0_16], %18 {strides = array<i32>} : memref<1x256x32xf32, #tpu.memory_space<vmem>>, vector<1x256x32xf32>,
    return
  }
  func.func @transform_0(%arg0: i32) -> (i32, i32, i32) {
    %c0_i32 = arith.constant 0 : i32
    %c0_i32_0 = arith.constant 0 : i32
    %c0_i32_1 = arith.constant 0 : i32
    return %arg0, %c0_i32, %c0_i32_0 : i32, i32, i32
  }
  func.func @transform_1(%arg0: i32) -> (i32, i32) {
    %c0_i32 = arith.constant 0 : i32
    %c0_i32_0 = arith.constant 0 : i32
    %c0_i32_1 = arith.constant 0 : i32
    return %c0_i32, %c0_i32_0 : i32, i32
  }
  func.func @transform_2(%arg0: i32) -> (i32, i32) {
    %c0_i32 = arith.constant 0 : i32
    %c0_i32_0 = arith.constant 0 : i32
    %c0_i32_1 = arith.constant 0 : i32
    return %c0_i32, %c0_i32_0 : i32, i32
  }
  func.func @transform_3(%arg0: i32) -> (i32, i32, i32) {
    %c0_i32 = arith.constant 0 : i32
    %c0_i32_0 = arith.constant 0 : i32
    %c0_i32_1 = arith.constant 0 : i32
    return %arg0, %c0_i32, %c0_i32_0 : i32, i32, i32
  }
}

</mosaic_0001>

<bundles_post_ra>
// kernel: tpu_custom_call.1
= control target key start
LH: loop header
LB: loop body
LE: loop exit
PB: predicated region body
PF: predicated region fallthrough
CT: control target
= control target key end

     0   :  { %s644_s12 = smov 0   ;;  %s944_s0 = inlined_call_operand.vmem [shape: f32[2,256,32], index: 0, kind: input, shape index: {}]   ;;  %s945_s1 = inlined_call_operand.vmem [shape: f32[32,2], index: 1, kind: input, shape index: {}]   ;;  %s946_s2 = inlined_call_operand.vmem [shape: f32[2,32], index: 2, kind: input, shape index: {}]   ;;  %s947_s3 = inlined_call_operand.vmem [shape: f32[2,256,32], index: 3, kind: output, shape index: {}]  }
   0x1 LB: > { %s560_s13 = sadd.s32 4294967295, %s620_s12   ;;  %p564_p0 = scmp.ge.s32.totalorder %s620_s12, 1  ;;  %s620_s12 = sphi %s644_s12, %s13_s12  }
   0x2   : > { %p137_p1 = scmp.lt.s32.totalorder %s620_s12, 3 }
   0x4   : > { %p138_p2 = pnand %p564_p0, %p137_p1 }
   0x5   : > { %p161_p3 = scmp.lt.s32.totalorder (!%p138_p2), %s560_s13, 1 }
   0x6   : > { %141 = sbr.rel (%p138_p2) target bundleno = 533 (0x215), region = 32 }
   0xb   : > { %v277_v0 = vld [vmem:[%s945_s1 + $0x18] sm:$0xff]  ;;  %v622_v1 = vmov 0.0   ;;  %v276_v2 = vld [vmem:[%s945_s1 + $0x10] sm:$0xff]  ;;  %vm623_vm0 = vmmov 0   ;;  %s949_s13 = smov (!%p161_p3, %s560_s13), 1  ;;  %v275_v3 = vld [vmem:[%s945_s1 + $0x8] sm:$0xff] }
   0xc   : > { %584 = vmatprep.subr.mxu0 %v622_v1  ;;  %592 = vmatprep.mubr.msk.f32.mxu0 %vm623_vm0, %v622_v1  ;;  %s575_s20 = sshll.u32 %s949_s13, 8  ;;  %vm203_vm1 = vcmask 261120   ;;  %v274_v4 = vld [vmem:[%s945_s1] sm:$0xff]  ;;  %vm357_vm2 = vcmask 1041408   ;;  %vm353_vm3 = vcmask 15360  }
   0xd   : > { %585 = vmatpush3.msra.mxu0 %v277_v0  ;;  %595 = vmatprep.subr.mxu1 %v622_v1  ;;  %s672_s25 = scalar_lea.vmem %s944_s0, %s575_s20  ;;  %s843_s30 = scalar_lea.vmem %s947_s3, %s575_s20 }
   0xe   : > { %586 = vmatprep.subr.mxu0 %v622_v1  ;;  %597 = vmatprep.mubr.msk.f32.mxu1 %vm623_vm0, %v622_v1  ;;  %v675_v5 = vld [vmem:[%s672_s25] sm:$0xff]  ;;  %v678_v6 = vld [vmem:[%s672_s25 + $0x8] sm:$0xff]  ;;  %v681_v7 = vld [vmem:[%s672_s25 + $0x10] sm:$0xff] }
   0xf   : > { %587 = vmatpush3.msra.mxu0 %v276_v2  ;;  %v684_v8 = vld [vmem:[%s672_s25 + $0x18] sm:$0xff]  ;;  %v204_v9 = vsel %vm203_vm1, %v675_v5, 0.0  ;;  %v205_v10 = vsel %vm203_vm1, %v678_v6, 0.0  ;;  %v207_v11 = vsel %vm203_vm1, %v681_v7, 0.0  ;;  %v693_v12 = vld [vmem:[%s672_s25 + $0x20] sm:$0xff]  ;;  %v698_v15 = vld [vmem:[%s672_s25 + $0x28] sm:$0xff] }
  0x10   : > { %588 = vmatprep.subr.mxu0 %v622_v1  ;;  %v206_v13 = vadd.f32 %v205_v10, %v204_v9  ;;  %v209_v14 = vsel %vm203_vm1, %v684_v8, 0.0  ;;  %v211_v17 = vsel %vm203_vm1, %v693_v12, 0.0  ;;  %v703_v18 = vld [vmem:[%s672_s25 + $0x30] sm:$0xff]  ;;  %v213_v20 = vsel %vm203_vm1, %v698_v15, 0.0  ;;  %v708_v21 = vld [vmem:[%s672_s25 + $0x38] sm:$0xff]  ;;  %v713_v24 = vld [vmem:[%s672_s25 + $0x40] sm:$0xff] }
  0x11   : > { %589 = vmatpush3.msra.mxu0 %v275_v3  ;;  %v215_v23 = vsel %vm203_vm1, %v703_v18, 0.0  ;;  %v217_v26 = vsel %vm203_vm1, %v708_v21, 0.0  ;;  %v718_v27 = vld [vmem:[%s672_s25 + $0x48] sm:$0xff]  ;;  %v219_v29 = vsel %vm203_vm1, %v713_v24, 0.0  ;;  %v723_v30 = vld [vmem:[%s672_s25 + $0x50] sm:$0xff]  ;;  %v728_v33 = vld [vmem:[%s672_s25 + $0x58] sm:$0xff] }
  0x12   : > { %590 = vmatprep.subr.mxu0 %v622_v1  ;;  %v208_v16 = vadd.f32 %v207_v11, %v206_v13  ;;  %v221_v32 = vsel %vm203_vm1, %v718_v27, 0.0  ;;  %v223_v35 = vsel %vm203_vm1, %v723_v30, 0.0  ;;  %v733_v36 = vld [vmem:[%s672_s25 + $0x60] sm:$0xff]  ;;  %v225_v38 = vsel %vm203_vm1, %v728_v33, 0.0  ;;  %v738_v39 = vld [vmem:[%s672_s25 + $0x68] sm:$0xff]  ;;  %v743_v42 = vld [vmem:[%s672_s25 + $0x70] sm:$0xff] }
  0x13   : > { %591 = vmatpush3.msra.mxu0 %v274_v4  ;;  %v227_v41 = vsel %vm203_vm1, %v733_v36, 0.0  ;;  %v229_v44 = vsel %vm203_vm1, %v738_v39, 0.0  ;;  %v748_v45 = vld [vmem:[%s672_s25 + $0x78] sm:$0xff]  ;;  %v231_v47 = vsel %vm203_vm1, %v743_v42, 0.0  ;;  %v753_v48 = vld [vmem:[%s672_s25 + $0x80] sm:$0xff]  ;;  %v758_v51 = vld [vmem:[%s672_s25 + $0x88] sm:$0xff] }
  0x14   : > { %v210_v19 = vadd.f32 %v209_v14, %v208_v16  ;;  %v233_v50 = vsel %vm203_vm1, %v748_v45, 0.0  ;;  %v235_v53 = vsel %vm203_vm1, %v753_v48, 0.0  ;;  %v763_v54 = vld [vmem:[%s672_s25 + $0x90] sm:$0xff]  ;;  %v237_v56 = vsel %vm203_vm1, %v758_v51, 0.0  ;;  %v768_v57 = vld [vmem:[%s672_s25 + $0x98] sm:$0xff]  ;;  %v773_v60 = vld [vmem:[%s672_s25 + $0xa0] sm:$0xff] }
  0x15   : > { %v239_v59 = vsel %vm203_vm1, %v763_v54, 0.0  ;;  %v241_v62 = vsel %vm203_vm1, %v768_v57, 0.0  ;;  %v778_v63 = vld [vmem:[%s672_s25 + $0xa8] sm:$0xff]  ;;  %v243_v1 = vsel %vm203_vm1, %v773_v60, 0.0  ;;  %v783_v2 = vld [vmem:[%s672_s25 + $0xb0] sm:$0xff]  ;;  %v788_v9 = vld [vmem:[%s672_s25 + $0xb8] sm:$0xff] }
  0x16   : > { %v212_v22 = vadd.f32 %v211_v17, %v210_v19  ;;  %v245_v4 = vsel %vm203_vm1, %v778_v63, 0.0  ;;  %v247_v11 = vsel %vm203_vm1, %v783_v2, 0.0  ;;  %v793_v13 = vld [vmem:[%s672_s25 + $0xc0] sm:$0xff]  ;;  %v249_v16 = vsel %vm203_vm1, %v788_v9, 0.0  ;;  %v798_v17 = vld [vmem:[%s672_s25 + $0xc8] sm:$0xff] }
  0x18   : > { %v214_v25 = vadd.f32 %v213_v20, %v212_v22  ;;  %v251_v20 = vsel %vm203_vm1, %v793_v13, 0.0  ;;  %v803_v22 = vld [vmem:[%s672_s25 + $0xd0] sm:$0xff] }
  0x1a   : > { %v216_v28 = vadd.f32 %v215_v23, %v214_v25  ;;  %v253_v25 = vsel %vm203_vm1, %v798_v17, 0.0 }
  0x1c   : > { %v218_v31 = vadd.f32 %v217_v26, %v216_v28  ;;  %v808_v26 = vld [vmem:[%s672_s25 + $0xd8] sm:$0xff] }
  0x1e   : > { %v220_v34 = vadd.f32 %v219_v29, %v218_v31  ;;  %v255_v29 = vsel %vm203_vm1, %v803_v22, 0.0  ;;  %v813_v31 = vld [vmem:[%s672_s25 + $0xe0] sm:$0xff] }
  0x20   : > { %v222_v37 = vadd.f32 %v221_v32, %v220_v34  ;;  %v257_v34 = vsel %vm203_vm1, %v808_v26, 0.0 }
  0x22   : > { %v224_v40 = vadd.f32 %v223_v35, %v222_v37  ;;  %v818_v35 = vld [vmem:[%s672_s25 + $0xe8] sm:$0xff] }
  0x24   : > { %v226_v43 = vadd.f32 %v225_v38, %v224_v40  ;;  %v259_v38 = vsel %vm203_vm1, %v813_v31, 0.0  ;;  %v823_v40 = vld [vmem:[%s672_s25 + $0xf0] sm:$0xff] }
  0x26   : > { %v228_v46 = vadd.f32 %v227_v41, %v226_v43  ;;  %v261_v43 = vsel %vm203_vm1, %v818_v35, 0.0 }
  0x28   : > { %v230_v49 = vadd.f32 %v229_v44, %v228_v46  ;;  %v828_v44 = vld [vmem:[%s672_s25 + $0xf8] sm:$0xff] }
  0x2a   : > { %v232_v52 = vadd.f32 %v231_v47, %v230_v49  ;;  %v263_v47 = vsel %vm203_vm1, %v823_v40, 0.0 }
  0x2c   : > { %v234_v55 = vadd.f32 %v233_v50, %v232_v52  ;;  %v265_v50 = vsel %vm203_vm1, %v828_v44, 0.0 }
  0x2e   : > { %v236_v58 = vadd.f32 %v235_v53, %v234_v55 }
  0x30   : > { %v238_v61 = vadd.f32 %v237_v56, %v236_v58 }
  0x32   : > { %v240_v0 = vadd.f32 %v239_v59, %v238_v61 }
  0x34   : > { %v242_v3 = vadd.f32 %v241_v62, %v240_v0 }
  0x36   : > { %v244_v10 = vadd.f32 %v243_v1, %v242_v3  ;;  %v352_v1 = vld [vmem:[%s946_s2] sm:$0x3] }
  0x37   : > { %596 = vmatpush3.msk.msra.mxu1 %vm357_vm2, %v352_v1 }
  0x38   : > { %v246_v14 = vadd.f32 %v245_v4, %v244_v10 }
  0x3a   : > { %v248_v19 = vadd.f32 %v247_v11, %v246_v14 }
  0x3c   : > { %v250_v23 = vadd.f32 %v249_v16, %v248_v19 }
  0x3e   : > { %v252_v28 = vadd.f32 %v251_v20, %v250_v23  ;;  %v437_v23 = vlaneseq }
  0x40   : > { %v254_v32 = vadd.f32 %v253_v25, %v252_v28  ;;  %v438_v25 = vshrl.u32 %v437_v23, 7 }
  0x42   : > { %v256_v37 = vadd.f32 %v255_v29, %v254_v32  ;;  %v439_v28 = vsub.s32 0, %v438_v25 }
  0x44   : > { %v258_v41 = vadd.f32 %v257_v34, %v256_v37 }
  0x46   : > { %v260_v46 = vadd.f32 %v259_v38, %v258_v41 }
  0x48   : > { %v262_v49 = vadd.f32 %v261_v43, %v260_v46 }
  0x4a   : > { %v264_v52 = vadd.f32 %v263_v47, %v262_v49 }
  0x4c   : > { %v266_v53 = vadd.f32 %v265_v50, %v264_v52 }
  0x4e   : > { %v267_v55 = vrot.slane %v266_v53, 4 }
  0x50   : > { %v268_v56 = vadd.f32 %v267_v55, %v266_v53 }
  0x52   : > { %v269_v58 = vrot.slane %v268_v56, 2 }
  0x54   : > { %v270_v59 = vadd.f32 %v269_v58, %v268_v56 }
  0x56   : > { %v271_v61 = vrot.slane %v270_v59, 1 }
  0x58   : > { %v272_v62 = vadd.f32 %v271_v61, %v270_v59 }
  0x5a   : > { %v273_v0 = vmul.f32 0.00390625, %v272_v62 }
  0x5c   : > { %593 = vmatmul.mubr.msk.f32.vlgmr.msra.gmra.mxu0 %vm203_vm1, %v273_v0 }
 0x11c   : > { %v347_v3 = vpop.f32.mrf.mxu0 }
 0x11d   : > { %v351_v4 = vmax.f32 %v347_v3, 0.0 }
 0x11e   : > { %v594_v10 = vpop.f32.mrf.mxu0 }
 0x11f   : > { %598 = vmatmul.mubr.msk.f32.vlgmr.msra.gmra.mxu1 %vm353_vm3, %v351_v4 }
 0x1df   : > { %v427_v11 = vpop.f32.mrf.mxu1 }
 0x1e0   : > { %v572_v14 = vmul.f32 -1.442695, %v427_v11 }
 0x1e1   : > { %v599_v16 = vpop.f32.mrf.mxu1 }
 0x1e2   : > { %610 = vpow2.f32 %v572_v14 }
 0x1ef   : > { %v611_v19 = vpop.eup %610 }
 0x1f0   : > { %v434_v20 = vadd.f32 1.0, %v611_v19 }
 0x1f2   : > { %612 = vrcp.f32 %v434_v20 }
 0x1ff   : > { %v613_v29 = vpop.eup %612 }
 0x200   : > { %v440_v32 = vrot.slane %v613_v29, %v439_v28 }
 0x202   : > { %v441_v34 = vmul.f32 %v440_v32, %v675_v5  ;;  %v442_v37 = vmul.f32 %v440_v32, %v678_v6  ;;  %v443_v38 = vmul.f32 %v440_v32, %v681_v7  ;;  %v444_v41 = vmul.f32 %v440_v32, %v684_v8 }
 0x203   : > { %v445_v43 = vmul.f32 %v440_v32, %v693_v12  ;;  %v446_v46 = vmul.f32 %v440_v32, %v698_v15  ;;  %v447_v47 = vmul.f32 %v440_v32, %v703_v18  ;;  %v448_v49 = vmul.f32 %v440_v32, %v708_v21 }
 0x204   : > { %v449_v5 = vmul.f32 %v440_v32, %v713_v24  ;;  %v450_v6 = vmul.f32 %v440_v32, %v718_v27  ;;  %v451_v7 = vmul.f32 %v440_v32, %v723_v30  ;;  %v452_v8 = vmul.f32 %v440_v32, %v728_v33  ;;  %473 = vst.msk [vmem:[%s843_s30] sm:$0xff] %vm203_vm1, %v441_v34 }
 0x205   : > { %474 = vst.msk [vmem:[%s843_s30 + $0x8] sm:$0xff] %vm203_vm1, %v442_v37  ;;  %475 = vst.msk [vmem:[%s843_s30 + $0x10] sm:$0xff] %vm203_vm1, %v443_v38  ;;  %v453_v12 = vmul.f32 %v440_v32, %v733_v36  ;;  %v454_v15 = vmul.f32 %v440_v32, %v738_v39  ;;  %v455_v18 = vmul.f32 %v440_v32, %v743_v42 }
 0x206   : > { %476 = vst.msk [vmem:[%s843_s30 + $0x18] sm:$0xff] %vm203_vm1, %v444_v41  ;;  %v456_v21 = vmul.f32 %v440_v32, %v748_v45  ;;  %477 = vst.msk [vmem:[%s843_s30 + $0x20] sm:$0xff] %vm203_vm1, %v445_v43  ;;  %v457_v24 = vmul.f32 %v440_v32, %v753_v48  ;;  %v458_v27 = vmul.f32 %v440_v32, %v758_v51 }
 0x207   : > { %478 = vst.msk [vmem:[%s843_s30 + $0x28] sm:$0xff] %vm203_vm1, %v446_v46  ;;  %479 = vst.msk [vmem:[%s843_s30 + $0x30] sm:$0xff] %vm203_vm1, %v447_v47  ;;  %v459_v30 = vmul.f32 %v440_v32, %v763_v54  ;;  %v460_v33 = vmul.f32 %v440_v32, %v768_v57  ;;  %v461_v36 = vmul.f32 %v440_v32, %v773_v60 }
 0x208   : > { %480 = vst.msk [vmem:[%s843_s30 + $0x38] sm:$0xff] %vm203_vm1, %v448_v49  ;;  %481 = vst.msk [vmem:[%s843_s30 + $0x40] sm:$0xff] %vm203_vm1, %v449_v5  ;;  %v462_v39 = vmul.f32 %v440_v32, %v778_v63  ;;  %v463_v42 = vmul.f32 %v440_v32, %v783_v2  ;;  %v464_v45 = vmul.f32 %v440_v32, %v788_v9 }
 0x209   : > { %482 = vst.msk [vmem:[%s843_s30 + $0x48] sm:$0xff] %vm203_vm1, %v450_v6  ;;  %483 = vst.msk [vmem:[%s843_s30 + $0x50] sm:$0xff] %vm203_vm1, %v451_v7  ;;  %v465_v48 = vmul.f32 %v440_v32, %v793_v13  ;;  %v466_v51 = vmul.f32 %v440_v32, %v798_v17  ;;  %v467_v54 = vmul.f32 %v440_v32, %v803_v22 }
 0x20a   : > { %484 = vst.msk [vmem:[%s843_s30 + $0x58] sm:$0xff] %vm203_vm1, %v452_v8  ;;  %485 = vst.msk [vmem:[%s843_s30 + $0x60] sm:$0xff] %vm203_vm1, %v453_v12  ;;  %v468_v57 = vmul.f32 %v440_v32, %v808_v26  ;;  %v469_v60 = vmul.f32 %v440_v32, %v813_v31  ;;  %v470_v63 = vmul.f32 %v440_v32, %v818_v35 }
 0x20b   : > { %486 = vst.msk [vmem:[%s843_s30 + $0x68] sm:$0xff] %vm203_vm1, %v454_v15  ;;  %487 = vst.msk [vmem:[%s843_s30 + $0x70] sm:$0xff] %vm203_vm1, %v455_v18  ;;  %v471_v2 = vmul.f32 %v440_v32, %v823_v40  ;;  %v472_v9 = vmul.f32 %v440_v32, %v828_v44 }
 0x20c   : > { %488 = vst.msk [vmem:[%s843_s30 + $0x78] sm:$0xff] %vm203_vm1, %v456_v21  ;;  %489 = vst.msk [vmem:[%s843_s30 + $0x80] sm:$0xff] %vm203_vm1, %v457_v24 }
 0x20d   : > { %490 = vst.msk [vmem:[%s843_s30 + $0x88] sm:$0xff] %vm203_vm1, %v458_v27  ;;  %491 = vst.msk [vmem:[%s843_s30 + $0x90] sm:$0xff] %vm203_vm1, %v459_v30 }
 0x20e   : > { %492 = vst.msk [vmem:[%s843_s30 + $0x98] sm:$0xff] %vm203_vm1, %v460_v33  ;;  %493 = vst.msk [vmem:[%s843_s30 + $0xa0] sm:$0xff] %vm203_vm1, %v461_v36 }
 0x20f   : > { %494 = vst.msk [vmem:[%s843_s30 + $0xa8] sm:$0xff] %vm203_vm1, %v462_v39  ;;  %495 = vst.msk [vmem:[%s843_s30 + $0xb0] sm:$0xff] %vm203_vm1, %v463_v42 }
 0x210   : > { %496 = vst.msk [vmem:[%s843_s30 + $0xb8] sm:$0xff] %vm203_vm1, %v464_v45  ;;  %497 = vst.msk [vmem:[%s843_s30 + $0xc0] sm:$0xff] %vm203_vm1, %v465_v48 }
 0x211   : > { %498 = vst.msk [vmem:[%s843_s30 + $0xc8] sm:$0xff] %vm203_vm1, %v466_v51  ;;  %499 = vst.msk [vmem:[%s843_s30 + $0xd0] sm:$0xff] %vm203_vm1, %v467_v54 }
 0x212   : > { %500 = vst.msk [vmem:[%s843_s30 + $0xd8] sm:$0xff] %vm203_vm1, %v468_v57  ;;  %501 = vst.msk [vmem:[%s843_s30 + $0xe0] sm:$0xff] %vm203_vm1, %v469_v60 }
 0x213   : > { %502 = vst.msk [vmem:[%s843_s30 + $0xe8] sm:$0xff] %vm203_vm1, %v470_v63  ;;  %503 = vst.msk [vmem:[%s843_s30 + $0xf0] sm:$0xff] %vm203_vm1, %v471_v2 }
 0x214   : > { %504 = vst.msk [vmem:[%s843_s30 + $0xf8] sm:$0xff] %vm203_vm1, %v472_v9 }
 0x215 PF: > { %s13_s12 = sadd.s32 1, %s620_s12  }
 0x216   : > { %p10_p4 = scmp.ge.s32.totalorder %s13_s12, 4  }
 0x218   :  { %12 = sbr.rel (!%p10_p4) target bundleno = 1 (0x1), region = 62 }

</bundles_post_ra>
